<compile_context>
chip_gen: v6e
topology: v6e:2x2x1
jax: 0.10.0
libtpu: 0.0.40
codegen_flags: <defaults>
</compile_context>

<pallas_src>
import jax
import jax.numpy as jnp
import numpy as np
from jax.experimental import pallas as pl
from jax.experimental.pallas import tpu as pltpu


def _round_up(x, m):
    return (x + m - 1) // m * m


def _stack_weights(w_oihw, scale, cin_pad, cout_pad):
    """Fold BN scale into conv weights, pad channels, reorder to (cout_pad, 9*cin_pad).

    K-index layout: col = tap * cin_pad + ci, with tap = dy*3 + dx (row-major 3x3).
    """
    o, i, kh, kw = w_oihw.shape
    assert (kh, kw) == (3, 3)
    w = w_oihw.astype(jnp.float32) * scale.astype(jnp.float32)[:, None, None, None]
    w = jnp.transpose(w, (2, 3, 1, 0))                                  # (3,3,I,O)
    w = jnp.pad(w, ((0, 0), (0, 0), (0, cin_pad - i), (0, cout_pad - o)))
    w = w.reshape(9, cin_pad, cout_pad)
    w = jnp.transpose(w, (2, 0, 1)).reshape(cout_pad, 9 * cin_pad)      # (O, 9*I)
    return w.astype(jnp.bfloat16)


def fold_basic_block_params(w1_oihw, bn1, w2_oihw, bn2, eps=1e-5):
    """One-time BN folding + weight stacking (hoisted out of the forward path)."""
    cout, cin = w1_oihw.shape[0], w1_oihw.shape[1]
    assert cin == cout, "identity-shortcut config requires in_planes == planes"
    cp = _round_up(cin, 16)          # bf16 sublane-tile aligned channel padding

    g1, b1, m1, v1 = bn1
    g2, b2, m2, v2 = bn2
    scale1 = g1 / jnp.sqrt(v1 + eps)
    bias1 = b1 - m1 * scale1
    scale2 = g2 / jnp.sqrt(v2 + eps)
    bias2 = b2 - m2 * scale2

    w1k = _stack_weights(w1_oihw, scale1, cp, cp)          # (CP, 9*CP) bf16
    w2k = _stack_weights(w2_oihw, scale2, cp, cp)          # (CP, 9*CP) bf16
    biases = jnp.stack([jnp.pad(bias1, (0, cp - cout)),
                        jnp.pad(bias2, (0, cp - cout))]).astype(jnp.float32)
    biases = biases.reshape(2, cp, 1)
    return {"w1k": w1k, "w2k": w2k, "biases": biases}


@jax.jit
def basic_block_forward(x_nchw, params):
    """Fused conv-bn-relu-conv-bn-(+identity)-relu.  stride=1, Cin==Cout."""
    # TODO(synk): stride!=1 / option-A channel-padded downsample shortcut not implemented.
    w1k, w2k, biases = params["w1k"], params["w2k"], params["biases"]
    N, Cin, H, W = x_nchw.shape
    Cout = Cin
    CP = w1k.shape[0]                      # padded channel count (multiple of 16)

    Hp, Wp = H + 2, W + 2
    S = Hp * Wp                            # flattened padded size per image
    MARGIN = Wp + 1                        # max |flattened tap offset|
    LW = _round_up(S, 128)                 # lane-dense working / output width
    LE = LW + 2 * MARGIN                   # conv1 output extent
    LE2 = LW + 4 * MARGIN                  # conv1 input extent

    # Flattened lane offset of each 3x3 tap (row-major dy, dx).
    deltas = tuple((dy - 1) * Wp + (dx - 1) for dy in range(3) for dx in range(3))

    # ---- activations: NCHW -> per-image channel-padded, flat, lane-padded ----
    xf = x_nchw.astype(jnp.float32)
    x_pad = jnp.pad(xf, ((0, 0), (0, CP - Cin), (1, 1), (1, 1)))    # (N,CP,Hp,Wp)
    x_flat = x_pad.reshape(N, CP, S)
    x_ext = jnp.pad(x_flat, ((0, 0), (0, 0),
                             (2 * MARGIN, LE2 - 2 * MARGIN - S)))   # (N,CP,LE2)
    x_ext = x_ext.astype(jnp.bfloat16)

    # Interior mask over the conv1 output extent: 1 at true pixels, 0 at the
    # per-image zero border, lane padding and margins.  Applying it to the
    # conv1 output makes that tensor the zero-padded conv2 input for free.
    hh = jnp.arange(Hp)
    ww = jnp.arange(Wp)
    m2d = (((hh >= 1) & (hh <= H))[:, None]
           & ((ww >= 1) & (ww <= W))[None, :]).astype(jnp.float32)
    mask = jnp.pad(m2d.reshape(1, S), ((0, 0), (MARGIN, LE - MARGIN - S)))

    def kernel(x_ref, w1_ref, w2_ref, b_ref, m_ref, o_ref):
        x = x_ref[0]                                          # (CP, LE2) bf16

        # ---- conv1 (+ folded bn1, relu): 9-tap K-stack, ONE MXU matmul ----
        xs = jnp.concatenate(
            [x[:, MARGIN + d:MARGIN + d + LE] for d in deltas], axis=0)
        z1 = jnp.dot(w1_ref[...], xs,
                     preferred_element_type=jnp.float32)      # (CP, LE) f32
        out1 = jnp.maximum(z1 + b_ref[0], 0.0) * m_ref[...]   # zero-padded
        out1 = out1.astype(jnp.bfloat16)

        # ---- conv2 (+ folded bn2): same K-stacked matmul ------------------
        ys = jnp.concatenate(
            [out1[:, MARGIN + d:MARGIN + d + LW] for d in deltas], axis=0)
        z2 = jnp.dot(w2_ref[...], ys,
                     preferred_element_type=jnp.float32)      # (CP, LW) f32

        # ---- identity shortcut + final relu -------------------------------
        shortcut = x[:, 2 * MARGIN:2 * MARGIN + LW].astype(jnp.float32)
        o_ref[0] = jnp.maximum(z2 + b_ref[1] + shortcut, 0.0).astype(o_ref.dtype)

    out_flat = pl.pallas_call(
        kernel,
        out_shape=jax.ShapeDtypeStruct((N, CP, LW), jnp.float32),
        grid=(N,),                                   # one image per grid step
        in_specs=[
            pl.BlockSpec((1, CP, LE2), lambda n: (n, 0, 0)),
            pl.BlockSpec((CP, 9 * CP), lambda n: (0, 0)),
            pl.BlockSpec((CP, 9 * CP), lambda n: (0, 0)),
            pl.BlockSpec((2, CP, 1),   lambda n: (0, 0, 0)),
            pl.BlockSpec((1, LE),      lambda n: (0, 0)),
        ],
        out_specs=pl.BlockSpec((1, CP, LW), lambda n: (n, 0, 0)),
        compiler_params=pltpu.CompilerParams(
            dimension_semantics=("parallel",)),
    )(x_ext, w1k, w2k, biases, mask)

    # (N, CP, LW) -> (N, Cout, H, W): drop channel/lane padding and the border.
    out = out_flat[:, :Cout, :S].reshape(N, Cout, Hp, Wp)
    return out[:, :, 1:H + 1, 1:W + 1]


# ---------------- pure-JAX reference (PyTorch semantics, eval-mode BN) -------
def _ref_forward(x, w1_oihw, bn1, w2_oihw, bn2, eps=1e-5):
    def conv(x, w):
        return jax.lax.conv_general_dilated(
            x, w, window_strides=(1, 1), padding=((1, 1), (1, 1)),
            dimension_numbers=('NCHW', 'OIHW', 'NCHW'))

    def bn(x, p):
        g, b, m, v = p
        g, b, m, v = (t[None, :, None, None] for t in (g, b, m, v))
        return (x - m) / jnp.sqrt(v + eps) * g + b

    out = jax.nn.relu(bn(conv(x, w1_oihw), bn1))
    out = bn(conv(out, w2_oihw), bn2)
    out = out + x            # identity shortcut (stride=1, in_planes==planes)
    return jax.nn.relu(out)


if __name__ == "__main__":
    # Small shapes: batch=2, in_planes=planes=4, spatial 16x16, stride=1.
    N, C, H, W = 2, 4, 16, 16
    eps = 1e-5

    key = jax.random.PRNGKey(0)
    k = jax.random.split(key, 12)

    x = jax.random.normal(k[0], (N, C, H, W), jnp.float32)

    # conv weights in PyTorch OIHW layout, deterministic init
    w1_oihw = 0.2 * jax.random.normal(k[1], (C, C, 3, 3), jnp.float32)
    w2_oihw = 0.2 * jax.random.normal(k[2], (C, C, 3, 3), jnp.float32)

    # BatchNorm parameters + running stats (eval-mode semantics)
    g1 = 1.0 + 0.1 * jax.random.normal(k[3], (C,), jnp.float32)
    b1 = 0.1 * jax.random.normal(k[4], (C,), jnp.float32)
    m1 = 0.1 * jax.random.normal(k[5], (C,), jnp.float32)
    v1 = 1.0 + 0.1 * jax.random.uniform(k[6], (C,), jnp.float32)

    g2 = 1.0 + 0.1 * jax.random.normal(k[7], (C,), jnp.float32)
    b2 = 0.1 * jax.random.normal(k[8], (C,), jnp.float32)
    m2 = 0.1 * jax.random.normal(k[9], (C,), jnp.float32)
    v2 = 1.0 + 0.1 * jax.random.uniform(k[10], (C,), jnp.float32)

    bn1 = (g1, b1, m1, v1)
    bn2 = (g2, b2, m2, v2)

    # One-time BN folding / weight stacking (kept out of the forward path).
    params = fold_basic_block_params(w1_oihw, bn1, w2_oihw, bn2, eps=eps)
    params = jax.tree_util.tree_map(jax.block_until_ready, params)

    out = basic_block_forward(x, params)
    out = jax.block_until_ready(out)

    ref = _ref_forward(x, w1_oihw, bn1, w2_oihw, bn2, eps=eps)
    ref = jax.block_until_ready(ref)

    # bf16 MXU inputs -> loosened tolerance (f32 accumulation keeps it tight).
    np.testing.assert_allclose(np.asarray(out), np.asarray(ref),
                               rtol=5e-2, atol=5e-2)
    print("KERNEL_OK")
</pallas_src>

<mosaic_0001>
module attributes {stable_mosaic.version = 11 : i64} {
  func.func @kernel(%arg0: i32, %arg1: memref<1x16x460xbf16, #tpu.memory_space<vmem>>, %arg2: memref<16x144xbf16, #tpu.memory_space<vmem>>, %arg3: memref<16x144xbf16, #tpu.memory_space<vmem>>, %arg4: memref<2x16x1xf32, #tpu.memory_space<vmem>>, %arg5: memref<1x422xf32, #tpu.memory_space<vmem>>, %arg6: memref<1x16x384xf32, #tpu.memory_space<vmem>>) attributes {dimension_semantics = [#tpu.dimension_semantics<parallel>], iteration_bounds = array<i64: 2>, scalar_prefetch = 0 : i64, scratch_operands = 0 : i64, tpu.core_type = #tpu.core_type<tc>, window_params = [{transform_indices = @transform_0, window_bounds = array<i64: 1, 16, 460>}, {pipeline_mode = #tpu.pipeline_mode<synchronous>, transform_indices = @transform_1, window_bounds = array<i64: 16, 144>}, {pipeline_mode = #tpu.pipeline_mode<synchronous>, transform_indices = @transform_2, window_bounds = array<i64: 16, 144>}, {pipeline_mode = #tpu.pipeline_mode<synchronous>, transform_indices = @transform_3, window_bounds = array<i64: 2, 16, 1>}, {pipeline_mode = #tpu.pipeline_mode<synchronous>, transform_indices = @transform_4, window_bounds = array<i64: 1, 422>}, {transform_indices = @transform_5, window_bounds = array<i64: 1, 16, 384>}]} {
    %c0 = arith.constant 0 : index
    %c0_0 = arith.constant 0 : index
    %c0_1 = arith.constant 0 : index
    %0 = vector.load %arg1[%c0, %c0_0, %c0_1] : memref<1x16x460xbf16, #tpu.memory_space<vmem>>, vector<1x16x460xbf16>
    %1 = vector.shape_cast %0 : vector<1x16x460xbf16> to vector<16x460xbf16>
    %2 = vector.extract_strided_slice %1 {offsets = [0, 0], sizes = [16, 422], strides = [1, 1]} : vector<16x460xbf16> to vector<16x422xbf16>
    %3 = vector.extract_strided_slice %1 {offsets = [0, 1], sizes = [16, 422], strides = [1, 1]} : vector<16x460xbf16> to vector<16x422xbf16>
    %4 = vector.extract_strided_slice %1 {offsets = [0, 2], sizes = [16, 422], strides = [1, 1]} : vector<16x460xbf16> to vector<16x422xbf16>
    %5 = vector.extract_strided_slice %1 {offsets = [0, 18], sizes = [16, 422], strides = [1, 1]} : vector<16x460xbf16> to vector<16x422xbf16>
    %6 = vector.extract_strided_slice %1 {offsets = [0, 19], sizes = [16, 422], strides = [1, 1]} : vector<16x460xbf16> to vector<16x422xbf16>
    %7 = vector.extract_strided_slice %1 {offsets = [0, 20], sizes = [16, 422], strides = [1, 1]} : vector<16x460xbf16> to vector<16x422xbf16>
    %8 = vector.extract_strided_slice %1 {offsets = [0, 36], sizes = [16, 422], strides = [1, 1]} : vector<16x460xbf16> to vector<16x422xbf16>
    %9 = vector.extract_strided_slice %1 {offsets = [0, 37], sizes = [16, 422], strides = [1, 1]} : vector<16x460xbf16> to vector<16x422xbf16>
    %10 = vector.extract_strided_slice %1 {offsets = [0, 38], sizes = [16, 422], strides = [1, 1]} : vector<16x460xbf16> to vector<16x422xbf16>
    %11 = tpu.concatenate %2, %3, %4, %5, %6, %7, %8, %9, %10 in 0 : vector<16x422xbf16>, vector<16x422xbf16>, vector<16x422xbf16>, vector<16x422xbf16>, vector<16x422xbf16>, vector<16x422xbf16>, vector<16x422xbf16>, vector<16x422xbf16>, vector<16x422xbf16> -> vector<144x422xbf16>
    %c0_2 = arith.constant 0 : index
    %c0_3 = arith.constant 0 : index
    %12 = vector.load %arg2[%c0_2, %c0_3] : memref<16x144xbf16, #tpu.memory_space<vmem>>, vector<16x144xbf16>
    %cst = arith.constant dense<0.000000e+00> : vector<16x422xf32>
    %13 = tpu.matmul %12, %11, %cst {dimension_numbers = #tpu.dot_dimension_numbers<[1], [0], [0], [1], [0, 0, 1, 1], [], []>} : vector<16x144xbf16>, vector<144x422xbf16>, vector<16x422xf32> -> vector<16x422xf32>
    %c0_4 = arith.constant 0 : index
    %c0_5 = arith.constant 0 : index
    %c0_6 = arith.constant 0 : index
    %14 = vector.load %arg4[%c0_4, %c0_5, %c0_6] : memref<2x16x1xf32, #tpu.memory_space<vmem>>, vector<1x16x1xf32>
    %15 = vector.shape_cast %14 : vector<1x16x1xf32> to vector<16x1xf32>
    %16 = vector.broadcast %15 : vector<16x1xf32> to vector<16x422xf32>
    %17 = arith.addf %13, %16 : vector<16x422xf32>
    %cst_7 = arith.constant 0.000000e+00 : f32
    %18 = vector.broadcast %cst_7 : f32 to vector<16x422xf32>
    %19 = arith.maximumf %17, %18 : vector<16x422xf32>
    %c0_8 = arith.constant 0 : index
    %c0_9 = arith.constant 0 : index
    %20 = vector.load %arg5[%c0_8, %c0_9] : memref<1x422xf32, #tpu.memory_space<vmem>>, vector<1x422xf32>
    %21 = vector.broadcast %20 : vector<1x422xf32> to vector<16x422xf32>
    %22 = arith.mulf %19, %21 : vector<16x422xf32>
    %23 = arith.truncf %22 : vector<16x422xf32> to vector<16x422xbf16>
    %24 = vector.extract_strided_slice %23 {offsets = [0, 0], sizes = [16, 384], strides = [1, 1]} : vector<16x422xbf16> to vector<16x384xbf16>
    %25 = vector.extract_strided_slice %23 {offsets = [0, 1], sizes = [16, 384], strides = [1, 1]} : vector<16x422xbf16> to vector<16x384xbf16>
    %26 = vector.extract_strided_slice %23 {offsets = [0, 2], sizes = [16, 384], strides = [1, 1]} : vector<16x422xbf16> to vector<16x384xbf16>
    %27 = vector.extract_strided_slice %23 {offsets = [0, 18], sizes = [16, 384], strides = [1, 1]} : vector<16x422xbf16> to vector<16x384xbf16>
    %28 = vector.extract_strided_slice %23 {offsets = [0, 19], sizes = [16, 384], strides = [1, 1]} : vector<16x422xbf16> to vector<16x384xbf16>
    %29 = vector.extract_strided_slice %23 {offsets = [0, 20], sizes = [16, 384], strides = [1, 1]} : vector<16x422xbf16> to vector<16x384xbf16>
    %30 = vector.extract_strided_slice %23 {offsets = [0, 36], sizes = [16, 384], strides = [1, 1]} : vector<16x422xbf16> to vector<16x384xbf16>
    %31 = vector.extract_strided_slice %23 {offsets = [0, 37], sizes = [16, 384], strides = [1, 1]} : vector<16x422xbf16> to vector<16x384xbf16>
    %32 = vector.extract_strided_slice %23 {offsets = [0, 38], sizes = [16, 384], strides = [1, 1]} : vector<16x422xbf16> to vector<16x384xbf16>
    %33 = tpu.concatenate %24, %25, %26, %27, %28, %29, %30, %31, %32 in 0 : vector<16x384xbf16>, vector<16x384xbf16>, vector<16x384xbf16>, vector<16x384xbf16>, vector<16x384xbf16>, vector<16x384xbf16>, vector<16x384xbf16>, vector<16x384xbf16>, vector<16x384xbf16> -> vector<144x384xbf16>
    %c0_10 = arith.constant 0 : index
    %c0_11 = arith.constant 0 : index
    %34 = vector.load %arg3[%c0_10, %c0_11] : memref<16x144xbf16, #tpu.memory_space<vmem>>, vector<16x144xbf16>
    %cst_12 = arith.constant dense<0.000000e+00> : vector<16x384xf32>
    %35 = tpu.matmul %34, %33, %cst_12 {dimension_numbers = #tpu.dot_dimension_numbers<[1], [0], [0], [1], [0, 0, 1, 1], [], []>} : vector<16x144xbf16>, vector<144x384xbf16>, vector<16x384xf32> -> vector<16x384xf32>
    %36 = vector.extract_strided_slice %1 {offsets = [0, 38], sizes = [16, 384], strides = [1, 1]} : vector<16x460xbf16> to vector<16x384xbf16>
    %37 = arith.extf %36 : vector<16x384xbf16> to vector<16x384xf32>
    %c1 = arith.constant 1 : index
    %c0_13 = arith.constant 0 : index
    %c0_14 = arith.constant 0 : index
    %38 = vector.load %arg4[%c1, %c0_13, %c0_14] : memref<2x16x1xf32, #tpu.memory_space<vmem>>, vector<1x16x1xf32>
    %39 = vector.shape_cast %38 : vector<1x16x1xf32> to vector<16x1xf32>
    %40 = vector.broadcast %39 : vector<16x1xf32> to vector<16x384xf32>
    %41 = arith.addf %35, %40 : vector<16x384xf32>
    %42 = arith.addf %41, %37 : vector<16x384xf32>
    %cst_15 = arith.constant 0.000000e+00 : f32
    %43 = vector.broadcast %cst_15 : f32 to vector<16x384xf32>
    %44 = arith.maximumf %42, %43 : vector<16x384xf32>
    %c0_16 = arith.constant 0 : index
    %c0_17 = arith.constant 0 : index
    %c0_18 = arith.constant 0 : index
    %45 = vector.load %arg6[%c0_16, %c0_17, %c0_18] : memref<1x16x384xf32, #tpu.memory_space<vmem>>, vector<1x16x384xf32>
    %46 = vector.shape_cast %45 : vector<1x16x384xf32> to vector<16x384xf32>
    %47 = vector.shape_cast %44 : vector<16x384xf32> to vector<1x16x384xf32>
    tpu.vector_store %arg6[%c0_16, %c0_17, %c0_18], %47 {strides = array<i32>} : memref<1x16x384xf32, #tpu.memory_space<vmem>>, vector<1x16x384xf32>,
    return
  }
  func.func @transform_0(%arg0: i32) -> (i32, i32, i32) {
    %c0_i32 = arith.constant 0 : i32
    %c0_i32_0 = arith.constant 0 : i32
    %c0_i32_1 = arith.constant 0 : i32
    return %arg0, %c0_i32, %c0_i32_0 : i32, i32, i32
  }
  func.func @transform_1(%arg0: i32) -> (i32, i32) {
    %c0_i32 = arith.constant 0 : i32
    %c0_i32_0 = arith.constant 0 : i32
    %c0_i32_1 = arith.constant 0 : i32
    return %c0_i32, %c0_i32_0 : i32, i32
  }
  func.func @transform_2(%arg0: i32) -> (i32, i32) {
    %c0_i32 = arith.constant 0 : i32
    %c0_i32_0 = arith.constant 0 : i32
    %c0_i32_1 = arith.constant 0 : i32
    return %c0_i32, %c0_i32_0 : i32, i32
  }
  func.func @transform_3(%arg0: i32) -> (i32, i32, i32) {
    %c0_i32 = arith.constant 0 : i32
    %c0_i32_0 = arith.constant 0 : i32
    %c0_i32_1 = arith.constant 0 : i32
    %c0_i32_2 = arith.constant 0 : i32
    return %c0_i32, %c0_i32_0, %c0_i32_1 : i32, i32, i32
  }
  func.func @transform_4(%arg0: i32) -> (i32, i32) {
    %c0_i32 = arith.constant 0 : i32
    %c0_i32_0 = arith.constant 0 : i32
    %c0_i32_1 = arith.constant 0 : i32
    return %c0_i32, %c0_i32_0 : i32, i32
  }
  func.func @transform_5(%arg0: i32) -> (i32, i32, i32) {
    %c0_i32 = arith.constant 0 : i32
    %c0_i32_0 = arith.constant 0 : i32
    %c0_i32_1 = arith.constant 0 : i32
    return %arg0, %c0_i32, %c0_i32_0 : i32, i32, i32
  }
}

</mosaic_0001>

<bundles_post_ra>
// kernel: basic_block_forward.1
= control target key start
LH: loop header
LB: loop body
LE: loop exit
PB: predicated region body
PF: predicated region fallthrough
CT: control target
= control target key end

     0   :  { %s1000_s18 = smov 0   ;;  %s1286_s0 = inlined_call_operand.vmem [shape: bf16[2,16,460], index: 0, kind: input, shape index: {}]   ;;  %s1287_s1 = inlined_call_operand.vmem [shape: bf16[16,144], index: 1, kind: input, shape index: {}]   ;;  %s1288_s2 = inlined_call_operand.vmem [shape: bf16[16,144], index: 2, kind: input, shape index: {}]   ;;  %s1289_s3 = inlined_call_operand.vmem [shape: f32[2,16,1], index: 3, kind: input, shape index: {}]   ;;  %s1290_s4 = inlined_call_operand.vmem [shape: f32[1,422], index: 4, kind: input, shape index: {}]   ;;  %s1291_s5 = inlined_call_operand.vmem [shape: f32[2,16,384], index: 5, kind: output, shape index: {}]  }
   0x1 LB: > { %s878_s19 = sadd.s32 4294967295, %s959_s18   ;;  %p882_p0 = scmp.ge.s32.totalorder %s959_s18, 1  ;;  %s959_s18 = sphi %s1000_s18, %s15_s18  }
   0x2   : > { %p187_p1 = scmp.lt.s32.totalorder %s959_s18, 3 }
   0x4   : > { %p188_p2 = pnand %p882_p0, %p187_p1 }
   0x5   : > { %p215_p3 = scmp.lt.s32.totalorder (!%p188_p2), %s878_s19, 1  ;;  %s961_s24 = smov (!%p188_p2), 91  }
   0x6   : > { %191 = sbr.rel (%p188_p2) target bundleno = 786 (0x312), region = 40  ;;  %s962_s25 = smov (!%p188_p2), 92  }
   0x7   : > { %s963_s26 = smov (!%p188_p2), 108   ;;  %s964_s27 = smov (!%p188_p2), 109  }
   0x8   : > { %s965_s28 = smov (!%p188_p2), 110   ;;  %s966_s29 = smov (!%p188_p2), 126  }
   0x9   : > { %s967_s30 = smov (!%p188_p2), 127   ;;  %s969_s8 = smov (!%p188_p2), 90  }
   0xb   : > { %s1293_s19 = smov (!%p215_p3, %s878_s19), 1  ;;  %v949_v8 = vld [vmem:[%s1287_s1 + $0x4] ss:$8 sps:$4 sm:$0xff]   ;;  %vm401_vm0 = vcmask 130048   ;;  %v968_v9 = vmov 0   ;;  %vm354_vm1 = vcmask 744448  }
   0xc   : > { %s902_s20 = sshll.u32 %s1293_s19, 5  ;;  %892 = vmatprep.mubr.msk.bf16.mxu0 %vm401_vm0, %v949_v8  ;;  %893 = vmatprep.mubr.msk.bf16.mxu1 %vm401_vm0, %v949_v8  ;;  %v380_v10 = vld [vmem:[%s1289_s3] sm:$0xff]  ;;  %v381_v11 = vld [vmem:[%s1289_s3 + $0x8] sm:$0xff]  ;;  %vm338_vm2 = vcmask 752640   ;;  %vm322_vm3 = vcmask 883712   ;;  %vm306_vm4 = vcmask 891904  }
   0xd   : > { %s219_s23 = scalar_lea.vmem %s1286_s0, %s902_s20  ;;  %921 = vset.pattern.permute.xlu0 %v968_v9  ;;  %922 = vset.pattern.permute.xlu1 %v968_v9  ;;  %vm290_vm5 = vcmask 900096   ;;  %vm274_vm6 = vcmask 1031168   ;;  %vm258_vm7 = vcmask 1039360   ;;  %vm370_vm8 = vcmask 736256  }
   0xe   : > { %v1014_v0 = vld [vmem:[%s219_s23] sm:$0xff]  ;;  %v1016_v1 = vld [vmem:[%s219_s23 + $0x10] sm:$0xff]  ;;  %v1018_v2 = vld [vmem:[%s219_s23 + $0x8] sm:$0xff] }
   0xf   : > { %v1022_v3 = vcombine.high %v1014_v0, %v1016_v1  ;;  %v1026_v4 = vcombine.low %v1014_v0, %v1016_v1  ;;  %v1028_v5 = vld [vmem:[%s219_s23 + $0x18] sm:$0xff] }
  0x10   : > { %v1036_v6 = vcombine.low %v1018_v2, %v1028_v5  ;;  %v1040_v7 = vcombine.high %v1018_v2, %v1028_v5 }
  0x11   : > { %348 = vrot.lane.b32.xlu0 %v1022_v3, %s961_s24  ;;  %346 = vrot.lane.b32.xlu1 %v1026_v4, %s961_s24 }
  0x15   : > { %350 = vrot.lane.b32.xlu0 %v1036_v6, %s961_s24  ;;  %352 = vrot.lane.b32.xlu1 %v1040_v7, %s961_s24 }
  0x19   : > { %332 = vrot.lane.b32.xlu0 %v1022_v3, %s962_s25  ;;  %334 = vrot.lane.b32.xlu1 %v1036_v6, %s962_s25 }
  0x1d   : > { %330 = vrot.lane.b32.xlu0 %v1026_v4, %s962_s25  ;;  %336 = vrot.lane.b32.xlu1 %v1040_v7, %s962_s25 }
  0x21   : > { %316 = vrot.lane.b32.xlu0 %v1022_v3, %s963_s26  ;;  %318 = vrot.lane.b32.xlu1 %v1036_v6, %s963_s26 }
  0x25   : > { %314 = vrot.lane.b32.xlu0 %v1026_v4, %s963_s26  ;;  %320 = vrot.lane.b32.xlu1 %v1040_v7, %s963_s26 }
  0x29   : > { %300 = vrot.lane.b32.xlu0 %v1022_v3, %s964_s27  ;;  %302 = vrot.lane.b32.xlu1 %v1036_v6, %s964_s27 }
  0x2d   : > { %298 = vrot.lane.b32.xlu0 %v1026_v4, %s964_s27  ;;  %304 = vrot.lane.b32.xlu1 %v1040_v7, %s964_s27 }
  0x31   : > { %284 = vrot.lane.b32.xlu0 %v1022_v3, %s965_s28  ;;  %286 = vrot.lane.b32.xlu1 %v1036_v6, %s965_s28 }
  0x35   : > { %282 = vrot.lane.b32.xlu0 %v1026_v4, %s965_s28  ;;  %288 = vrot.lane.b32.xlu1 %v1040_v7, %s965_s28 }
  0x39   : > { %268 = vrot.lane.b32.xlu0 %v1022_v3, %s966_s29  ;;  %270 = vrot.lane.b32.xlu1 %v1036_v6, %s966_s29 }
  0x3d   : > { %266 = vrot.lane.b32.xlu0 %v1026_v4, %s966_s29  ;;  %272 = vrot.lane.b32.xlu1 %v1040_v7, %s966_s29 }
  0x41   : > { %252 = vrot.lane.b32.xlu0 %v1022_v3, %s967_s30  ;;  %254 = vrot.lane.b32.xlu1 %v1036_v6, %s967_s30 }
  0x45   : > { %250 = vrot.lane.b32.xlu0 %v1026_v4, %s967_s30  ;;  %256 = vrot.lane.b32.xlu1 %v1040_v7, %s967_s30 }
  0x49   : > { %364 = vrot.lane.b32.xlu0 %v1022_v3, %s969_s8  ;;  %366 = vrot.lane.b32.xlu1 %v1036_v6, %s969_s8 }
  0x4d   : > { %362 = vrot.lane.b32.xlu0 %v1026_v4, %s969_s8  ;;  %368 = vrot.lane.b32.xlu1 %v1040_v7, %s969_s8 }
  0x51   : > { %384 = vperm.xlu0 %921, %v380_v10   ;;  %389 = vperm.xlu1 %922, %v381_v11  }
  0x83   : > { %v349_v12 = vpop.permute.xlu0 %348  ;;  %v347_v13 = vpop.permute.xlu1 %346 }
  0x84   : > { %v355_v18 = vsel %vm354_vm1, %v347_v13, %v349_v12 }
  0x87   : > { %v351_v14 = vpop.permute.xlu0 %350  ;;  %v353_v15 = vpop.permute.xlu1 %352 }
  0x88   : > { %448 = vmatprep.subr.bf16.mxu1 %v353_v15  ;;  %v356_v16 = vsel %vm354_vm1, %v349_v12, %v351_v14  ;;  %v357_v17 = vsel %vm354_vm1, %v351_v14, %v353_v15 }
  0x89   : > { %405 = vmatprep.subr.bf16.mxu0 %v356_v16  ;;  %449 = vmatpush1.bf16.msra.mxu1 %v357_v17 }
  0x8a   : > { %406 = vmatpush1.bf16.msra.mxu0 %v355_v18  ;;  %v499_v18 = vld [vmem:[%s1290_s4] sm:$0xf] }
  0x8b   : > { %v333_v19 = vpop.permute.xlu0 %332  ;;  %v335_v20 = vpop.permute.xlu1 %334 }
  0x8c   : > { %v340_v21 = vsel %vm338_vm2, %v333_v19, %v335_v20 }
  0x8d   : > { %407 = vmatprep.subr.bf16.mxu0 %v340_v21 }
  0x8f   : > { %v331_v22 = vpop.permute.xlu0 %330  ;;  %v337_v23 = vpop.permute.xlu1 %336 }
  0x90   : > { %450 = vmatprep.subr.bf16.mxu1 %v337_v23  ;;  %v339_v24 = vsel %vm338_vm2, %v331_v22, %v333_v19  ;;  %v341_v25 = vsel %vm338_vm2, %v335_v20, %v337_v23 }
  0x91   : > { %408 = vmatpush1.bf16.msra.mxu0 %v339_v24  ;;  %451 = vmatpush1.bf16.msra.mxu1 %v341_v25 }
  0x93   : > { %v317_v26 = vpop.permute.xlu0 %316  ;;  %v319_v27 = vpop.permute.xlu1 %318 }
  0x94   : > { %v324_v28 = vsel %vm322_vm3, %v317_v26, %v319_v27 }
  0x95   : > { %409 = vmatprep.subr.bf16.mxu0 %v324_v28 }
  0x97   : > { %v315_v29 = vpop.permute.xlu0 %314  ;;  %v321_v30 = vpop.permute.xlu1 %320 }
  0x98   : > { %452 = vmatprep.subr.bf16.mxu1 %v321_v30  ;;  %v323_v31 = vsel %vm322_vm3, %v315_v29, %v317_v26  ;;  %v325_v32 = vsel %vm322_vm3, %v319_v27, %v321_v30 }
  0x99   : > { %410 = vmatpush1.bf16.msra.mxu0 %v323_v31  ;;  %453 = vmatpush1.bf16.msra.mxu1 %v325_v32 }
  0x9b   : > { %v301_v33 = vpop.permute.xlu0 %300  ;;  %v303_v34 = vpop.permute.xlu1 %302 }
  0x9c   : > { %v308_v35 = vsel %vm306_vm4, %v301_v33, %v303_v34 }
  0x9d   : > { %411 = vmatprep.subr.bf16.mxu0 %v308_v35 }
  0x9f   : > { %v299_v36 = vpop.permute.xlu0 %298  ;;  %v305_v37 = vpop.permute.xlu1 %304 }
  0xa0   : > { %454 = vmatprep.subr.bf16.mxu1 %v305_v37  ;;  %v307_v38 = vsel %vm306_vm4, %v299_v36, %v301_v33  ;;  %v309_v39 = vsel %vm306_vm4, %v303_v34, %v305_v37 }
  0xa1   : > { %412 = vmatpush1.bf16.msra.mxu0 %v307_v38  ;;  %455 = vmatpush1.bf16.msra.mxu1 %v309_v39 }
  0xa3   : > { %v285_v40 = vpop.permute.xlu0 %284  ;;  %v287_v41 = vpop.permute.xlu1 %286 }
  0xa4   : > { %v292_v42 = vsel %vm290_vm5, %v285_v40, %v287_v41 }
  0xa5   : > { %413 = vmatprep.subr.bf16.mxu0 %v292_v42 }
  0xa7   : > { %v283_v43 = vpop.permute.xlu0 %282  ;;  %v289_v44 = vpop.permute.xlu1 %288 }
  0xa8   : > { %456 = vmatprep.subr.bf16.mxu1 %v289_v44  ;;  %v291_v45 = vsel %vm290_vm5, %v283_v43, %v285_v40  ;;  %v293_v46 = vsel %vm290_vm5, %v287_v41, %v289_v44 }
  0xa9   : > { %414 = vmatpush1.bf16.msra.mxu0 %v291_v45  ;;  %457 = vmatpush1.bf16.msra.mxu1 %v293_v46 }
  0xab   : > { %v269_v47 = vpop.permute.xlu0 %268  ;;  %v271_v48 = vpop.permute.xlu1 %270 }
  0xac   : > { %v276_v49 = vsel %vm274_vm6, %v269_v47, %v271_v48 }
  0xad   : > { %415 = vmatprep.subr.bf16.mxu0 %v276_v49 }
  0xaf   : > { %v267_v50 = vpop.permute.xlu0 %266  ;;  %v273_v51 = vpop.permute.xlu1 %272 }
  0xb0   : > { %458 = vmatprep.subr.bf16.mxu1 %v273_v51  ;;  %v275_v52 = vsel %vm274_vm6, %v267_v50, %v269_v47  ;;  %v277_v53 = vsel %vm274_vm6, %v271_v48, %v273_v51 }
  0xb1   : > { %416 = vmatpush1.bf16.msra.mxu0 %v275_v52  ;;  %459 = vmatpush1.bf16.msra.mxu1 %v277_v53 }
  0xb3   : > { %v253_v54 = vpop.permute.xlu0 %252  ;;  %v255_v55 = vpop.permute.xlu1 %254 }
  0xb4   : > { %v260_v56 = vsel %vm258_vm7, %v253_v54, %v255_v55 }
  0xb5   : > { %417 = vmatprep.subr.bf16.mxu0 %v260_v56 }
  0xb7   : > { %v251_v57 = vpop.permute.xlu0 %250  ;;  %v257_v58 = vpop.permute.xlu1 %256 }
  0xb8   : > { %460 = vmatprep.subr.bf16.mxu1 %v257_v58  ;;  %v259_v59 = vsel %vm258_vm7, %v251_v57, %v253_v54  ;;  %v261_v60 = vsel %vm258_vm7, %v255_v55, %v257_v58 }
  0xb9   : > { %418 = vmatpush1.bf16.msra.mxu0 %v259_v59  ;;  %461 = vmatpush1.bf16.msra.mxu1 %v261_v60  ;;  %v950_v59 = vld [vmem:[%s1288_s2 + $0x4] ss:$8 sps:$4 sm:$0xff]   ;;  %v653_v60 = vunpack.c.l.bf16 %v1018_v2 }
  0xba   : > { %419 = vmatprep.subr.bf16.mxu0 %v1022_v3  ;;  %462 = vmatprep.subr.bf16.mxu1 %v1040_v7  ;;  %v947_v3 = vld [vmem:[%s1287_s1] ss:$8 sps:$4 sm:$0xff]  }
  0xbb   : > { %v365_v61 = vpop.permute.xlu0 %364  ;;  %v367_v62 = vpop.permute.xlu1 %366 }
  0xbc   : > { %v372_v63 = vsel %vm370_vm8, %v365_v61, %v367_v62 }
  0xbd   : > { %420 = vmatpush1.bf16.msra.mxu0 %v1026_v4  ;;  %463 = vmatpush1.bf16.msra.mxu1 %v1036_v6  ;;  %v501_v4 = vlaneseq }
  0xbe   : > { %435 = vmatprep.subr.bf16.mxu0 %v372_v63  ;;  %v652_v63 = vunpack.c.h.bf16 %v1014_v0 }
  0xbf   : > { %v363_v8 = vpop.permute.xlu0 %362  ;;  %v369_v10 = vpop.permute.xlu1 %368  ;;  %v502_v6 = vshrl.u32 %v501_v4, 7  ;;  %v655_v4 = vunpack.c.l.bf16 %v1016_v1 }
  0xc0   : > { %478 = vmatprep.subr.bf16.mxu1 %v369_v10  ;;  %v371_v11 = vsel %vm370_vm8, %v363_v8, %v365_v61  ;;  %v373_v12 = vsel %vm370_vm8, %v367_v62, %v369_v10  ;;  %v654_v61 = vunpack.c.h.bf16 %v1018_v2  ;;  %v651_v62 = vunpack.c.l.bf16 %v1014_v0  ;;  %v895_v8 = vld [vmem:[%s1289_s3 + $0x18] sm:$0xff]  ;;  %v894_v10 = vld [vmem:[%s1289_s3 + $0x10] sm:$0xff] }
  0xc1   : > { %436 = vmatpush2.bf16.msra.mxu0 %v371_v11  ;;  %479 = vmatpush2.bf16.msra.mxu1 %v373_v12  ;;  %v503_v15 = vsub.s32 0, %v502_v6  ;;  %v511_v16 = vsub.s32 2, %v502_v6  ;;  %v507_v43 = vsub.s32 1, %v502_v6  ;;  %v515_v49 = vsub.s32 3, %v502_v6 }
  0xc2   : > { %727 = vmatprep.subr.bf16.mxu1 %v968_v9  ;;  %v657_v11 = vunpack.c.l.bf16 %v1028_v5  ;;  %v658_v12 = vunpack.c.h.bf16 %v1028_v5  ;;  %v923_v2 = vpack.i.bf16 %v652_v63, %v651_v62  ;;  %v656_v0 = vunpack.c.h.bf16 %v1016_v1 }
  0xc3   : > { %v504_v25 = vrot.slane %v499_v18, %v503_v15  ;;  %v512_v26 = vrot.slane %v499_v18, %v511_v16  ;;  %v508_v47 = vrot.slane %v499_v18, %v507_v43  ;;  %v516_v54 = vrot.slane %v499_v18, %v515_v49 }
  0xc4   : > { %438 = vmatmul.mubr.bf16.vlgmr.msra.gmra.mxu0 %v947_v3  ;;  %481 = vmatmul.mubr.bf16.vlgmr.msra.gmra.mxu1 %v947_v3  ;;  %v928_v3 = vpack.i.bf16 %v654_v61, %v653_v60  ;;  %v938_v6 = vpack.i.bf16 %v658_v12, %v657_v11 }
  0xc5   : > { %898 = vmatprep.mubr.msk.bf16.mxu0 %vm401_vm0, %v950_v59  ;;  %899 = vmatprep.mubr.msk.bf16.mxu1 %vm401_vm0, %v950_v59 }
  0xcc   : > { %v385_v7 = vpop.permute.xlu0 %384  ;;  %v390_v22 = vpop.permute.xlu1 %389 }
 0x184   : > { %v439_v13 = vpop.f32.mrf.mxu0  ;;  %v482_v14 = vpop.f32.mrf.mxu1 }
 0x185   : > { %v440_v17 = vadd.f32 %v439_v13, %v385_v7  ;;  %v483_v19 = vadd.f32 %v482_v14, %v385_v7 }
 0x186   : > { %v441_v20 = vpop.f32.mrf.mxu0  ;;  %v484_v21 = vpop.f32.mrf.mxu1 }
 0x187   : > { %v491_v27 = vmax.f32 %v440_v17, 0.0  ;;  %v493_v28 = vmax.f32 %v483_v19, 0.0  ;;  %v442_v42 = vadd.f32 %v441_v20, %v385_v7  ;;  %v485_v48 = vadd.f32 %v484_v21, %v385_v7 }
 0x188   : > { %v443_v23 = vpop.f32.mrf.mxu0  ;;  %v486_v24 = vpop.f32.mrf.mxu1  ;;  %v933_v7 = vpack.i.bf16 %v656_v0, %v655_v4 }
 0x189   : > { %v444_v29 = vadd.f32 %v443_v23, %v390_v22  ;;  %v487_v30 = vadd.f32 %v486_v24, %v390_v22  ;;  %v521_v33 = vmul.f32 %v504_v25, %v491_v27  ;;  %v523_v34 = vmul.f32 %v512_v26, %v493_v28 }
 0x18a   : > { %v445_v39 = vpop.f32.mrf.mxu0  ;;  %v488_v41 = vpop.f32.mrf.mxu1  ;;  %v492_v46 = vmax.f32 %v442_v42, 0.0  ;;  %v494_v53 = vmax.f32 %v485_v48, 0.0 }
 0x18b   : > { %v495_v31 = vmax.f32 %v444_v29, 0.0  ;;  %v497_v32 = vmax.f32 %v487_v30, 0.0  ;;  %v446_v40 = vadd.f32 %v445_v39, %v390_v22  ;;  %v489_v45 = vadd.f32 %v488_v41, %v390_v22 }
 0x18c   : > { %v522_v52 = vmul.f32 %v508_v47, %v492_v46  ;;  %v524_v57 = vmul.f32 %v516_v54, %v494_v53 }
 0x18d   : > { %v525_v35 = vmul.f32 %v504_v25, %v495_v31  ;;  %v527_v36 = vmul.f32 %v512_v26, %v497_v32  ;;  %v496_v44 = vmax.f32 %v446_v40, 0.0  ;;  %v498_v51 = vmax.f32 %v489_v45, 0.0 }
 0x18f   : > { %v1150_v37 = vpack.c.bf16 %v525_v35, %v521_v33  ;;  %v1152_v38 = vpack.c.bf16 %v527_v36, %v523_v34  ;;  %v526_v50 = vmul.f32 %v508_v47, %v496_v44  ;;  %v528_v56 = vmul.f32 %v516_v54, %v498_v51 }
 0x191   : > { %625 = vrot.lane.b32.xlu0 %v1152_v38, %s961_s24  ;;  %621 = vrot.lane.b32.xlu1 %v1150_v37, %s961_s24  ;;  %v1178_v55 = vpack.c.bf16 %v526_v50, %v522_v52  ;;  %v532_v58 = vpack.c.bf16 %v528_v56, %v524_v57 }
 0x195   : > { %611 = vrot.lane.b32.xlu0 %v1152_v38, %s962_s25  ;;  %607 = vrot.lane.b32.xlu1 %v1150_v37, %s962_s25 }
 0x199   : > { %597 = vrot.lane.b32.xlu0 %v1152_v38, %s963_s26  ;;  %593 = vrot.lane.b32.xlu1 %v1150_v37, %s963_s26 }
 0x19d   : > { %583 = vrot.lane.b32.xlu0 %v1152_v38, %s964_s27  ;;  %579 = vrot.lane.b32.xlu1 %v1150_v37, %s964_s27 }
 0x1a1   : > { %569 = vrot.lane.b32.xlu0 %v1152_v38, %s965_s28  ;;  %565 = vrot.lane.b32.xlu1 %v1150_v37, %s965_s28 }
 0x1a5   : > { %555 = vrot.lane.b32.xlu0 %v1152_v38, %s966_s29  ;;  %551 = vrot.lane.b32.xlu1 %v1150_v37, %s966_s29 }
 0x1a9   : > { %541 = vrot.lane.b32.xlu0 %v1152_v38, %s967_s30  ;;  %623 = vrot.lane.b32.xlu1 %v1178_v55, %s961_s24 }
 0x1ad   : > { %627 = vrot.lane.b32.xlu0 %v532_v58, %s961_s24  ;;  %609 = vrot.lane.b32.xlu1 %v1178_v55, %s962_s25 }
 0x1b1   : > { %613 = vrot.lane.b32.xlu0 %v532_v58, %s962_s25  ;;  %595 = vrot.lane.b32.xlu1 %v1178_v55, %s963_s26 }
 0x1b5   : > { %599 = vrot.lane.b32.xlu0 %v532_v58, %s963_s26  ;;  %581 = vrot.lane.b32.xlu1 %v1178_v55, %s964_s27 }
 0x1b9   : > { %585 = vrot.lane.b32.xlu0 %v532_v58, %s964_s27  ;;  %567 = vrot.lane.b32.xlu1 %v1178_v55, %s965_s28  ;;  %s903_s27 = smul.u32 48, %s1293_s19 }
 0x1bd   : > { %571 = vrot.lane.b32.xlu0 %v532_v58, %s965_s28  ;;  %553 = vrot.lane.b32.xlu1 %v1178_v55, %s966_s29 }
 0x1c1   : > { %557 = vrot.lane.b32.xlu0 %v532_v58, %s966_s29  ;;  %539 = vrot.lane.b32.xlu1 %v1178_v55, %s967_s30 }
 0x1c5   : > { %543 = vrot.lane.b32.xlu0 %v532_v58, %s967_s30  ;;  %537 = vrot.lane.b32.xlu1 %v1150_v37, %s967_s30  ;;  %s224_s30 = scalar_lea.vmem %s1291_s5, %s903_s27 }
 0x1c9   : > { %639 = vrot.lane.b32.xlu0 %v1152_v38, %s969_s8  ;;  %637 = vrot.lane.b32.xlu1 %v1178_v55, %s969_s8 }
 0x1cd   : > { %641 = vrot.lane.b32.xlu0 %v532_v58, %s969_s8  ;;  %635 = vrot.lane.b32.xlu1 %v1150_v37, %s969_s8 }
 0x1d1   : > { %669 = vperm.xlu0 %921, %v895_v8   ;;  %664 = vperm.xlu1 %922, %v894_v10  }
 0x1d5   : > { %929 = vrot.lane.b32.xlu0 %v928_v3, %s969_s8  ;;  %924 = vrot.lane.b32.xlu1 %v923_v2, %s969_s8 }
 0x1d9   : > { %939 = vrot.lane.b32.xlu0 %v938_v6, %s969_s8  ;;  %934 = vrot.lane.b32.xlu1 %v933_v7, %s969_s8 }
 0x203   : > { %v626_v13 = vpop.permute.xlu0 %625  ;;  %v622_v5 = vpop.permute.xlu1 %621 }
 0x207   : > { %v612_v14 = vpop.permute.xlu0 %611  ;;  %v608_v15 = vpop.permute.xlu1 %607 }
 0x20b   : > { %v598_v16 = vpop.permute.xlu0 %597  ;;  %v594_v17 = vpop.permute.xlu1 %593 }
 0x20f   : > { %v584_v18 = vpop.permute.xlu0 %583  ;;  %v580_v19 = vpop.permute.xlu1 %579 }
 0x213   : > { %v570_v20 = vpop.permute.xlu0 %569  ;;  %v566_v1 = vpop.permute.xlu1 %565 }
 0x217   : > { %v556_v21 = vpop.permute.xlu0 %555  ;;  %v552_v22 = vpop.permute.xlu1 %551 }
 0x21b   : > { %v542_v23 = vpop.permute.xlu0 %541  ;;  %v624_v24 = vpop.permute.xlu1 %623 }
 0x21c   : > { %v629_v25 = vsel %vm354_vm1, %v622_v5, %v624_v24  ;;  %v630_v26 = vsel %vm354_vm1, %v624_v24, %v626_v13 }
 0x21d   : > { %684 = vmatprep.subr.bf16.mxu0 %v630_v26 }
 0x21e   : > { %685 = vmatpush1.bf16.msra.mxu0 %v629_v25 }
 0x21f   : > { %v628_v27 = vpop.permute.xlu0 %627  ;;  %v610_v28 = vpop.permute.xlu1 %609 }
 0x220   : > { %v631_v29 = vsel %vm354_vm1, %v626_v13, %v628_v27  ;;  %v615_v30 = vsel %vm338_vm2, %v608_v15, %v610_v28  ;;  %v616_v31 = vsel %vm338_vm2, %v610_v28, %v612_v14 }
 0x221   : > { %686 = vmatprep.subr.bf16.mxu0 %v616_v31  ;;  %728 = vmatpush1.bf16.msra.mxu1 %v631_v29 }
 0x222   : > { %687 = vmatpush1.bf16.msra.mxu0 %v615_v30  ;;  %729 = vmatprep.subr.bf16.mxu1 %v968_v9 }
 0x223   : > { %v614_v32 = vpop.permute.xlu0 %613  ;;  %v596_v33 = vpop.permute.xlu1 %595 }
 0x224   : > { %v617_v34 = vsel %vm338_vm2, %v612_v14, %v614_v32  ;;  %v601_v35 = vsel %vm322_vm3, %v594_v17, %v596_v33  ;;  %v602_v36 = vsel %vm322_vm3, %v596_v33, %v598_v16 }
 0x225   : > { %688 = vmatprep.subr.bf16.mxu0 %v602_v36  ;;  %730 = vmatpush1.bf16.msra.mxu1 %v617_v34 }
 0x226   : > { %689 = vmatpush1.bf16.msra.mxu0 %v601_v35  ;;  %731 = vmatprep.subr.bf16.mxu1 %v968_v9 }
 0x227   : > { %v600_v39 = vpop.permute.xlu0 %599  ;;  %v582_v40 = vpop.permute.xlu1 %581 }
 0x228   : > { %v603_v41 = vsel %vm322_vm3, %v598_v16, %v600_v39  ;;  %v587_v42 = vsel %vm306_vm4, %v580_v19, %v582_v40  ;;  %v588_v43 = vsel %vm306_vm4, %v582_v40, %v584_v18 }
 0x229   : > { %690 = vmatprep.subr.bf16.mxu0 %v588_v43  ;;  %732 = vmatpush1.bf16.msra.mxu1 %v603_v41 }
 0x22a   : > { %691 = vmatpush1.bf16.msra.mxu0 %v587_v42  ;;  %733 = vmatprep.subr.bf16.mxu1 %v968_v9 }
 0x22b   : > { %v586_v44 = vpop.permute.xlu0 %585  ;;  %v568_v45 = vpop.permute.xlu1 %567 }
 0x22c   : > { %v589_v46 = vsel %vm306_vm4, %v584_v18, %v586_v44  ;;  %v573_v47 = vsel %vm290_vm5, %v566_v1, %v568_v45  ;;  %v574_v48 = vsel %vm290_vm5, %v568_v45, %v570_v20 }
 0x22d   : > { %692 = vmatprep.subr.bf16.mxu0 %v574_v48  ;;  %734 = vmatpush1.bf16.msra.mxu1 %v589_v46 }
 0x22e   : > { %693 = vmatpush1.bf16.msra.mxu0 %v573_v47  ;;  %735 = vmatprep.subr.bf16.mxu1 %v968_v9 }
 0x22f   : > { %v572_v49 = vpop.permute.xlu0 %571  ;;  %v554_v50 = vpop.permute.xlu1 %553 }
 0x230   : > { %v575_v51 = vsel %vm290_vm5, %v570_v20, %v572_v49  ;;  %v559_v52 = vsel %vm274_vm6, %v552_v22, %v554_v50  ;;  %v560_v53 = vsel %vm274_vm6, %v554_v50, %v556_v21 }
 0x231   : > { %694 = vmatprep.subr.bf16.mxu0 %v560_v53  ;;  %736 = vmatpush1.bf16.msra.mxu1 %v575_v51 }
 0x232   : > { %695 = vmatpush1.bf16.msra.mxu0 %v559_v52  ;;  %737 = vmatprep.subr.bf16.mxu1 %v968_v9 }
 0x233   : > { %v558_v54 = vpop.permute.xlu0 %557  ;;  %v540_v56 = vpop.permute.xlu1 %539 }
 0x234   : > { %v561_v57 = vsel %vm274_vm6, %v556_v21, %v558_v54  ;;  %v546_v58 = vsel %vm258_vm7, %v540_v56, %v542_v23 }
 0x235   : > { %696 = vmatprep.subr.bf16.mxu0 %v546_v58  ;;  %738 = vmatpush1.bf16.msra.mxu1 %v561_v57 }
 0x236   : > { %739 = vmatprep.subr.bf16.mxu1 %v968_v9 }
 0x237   : > { %v544_v59 = vpop.permute.xlu0 %543  ;;  %v538_v60 = vpop.permute.xlu1 %537 }
 0x238   : > { %v547_v61 = vsel %vm258_vm7, %v542_v23, %v544_v59  ;;  %v545_v62 = vsel %vm258_vm7, %v538_v60, %v540_v56 }
 0x239   : > { %697 = vmatpush1.bf16.msra.mxu0 %v545_v62  ;;  %740 = vmatpush1.bf16.msra.mxu1 %v547_v61 }
 0x23a   : > { %698 = vmatprep.subr.bf16.mxu0 %v1178_v55  ;;  %741 = vmatprep.subr.bf16.mxu1 %v968_v9  ;;  %v952_v55 = vld [vmem:[%s1288_s2] ss:$8 sps:$4 sm:$0xff]  }
 0x23b   : > { %v640_v63 = vpop.permute.xlu0 %639  ;;  %v638_v8 = vpop.permute.xlu1 %637 }
 0x23c   : > { %v644_v10 = vsel %vm370_vm8, %v638_v8, %v640_v63 }
 0x23d   : > { %699 = vmatpush1.bf16.msra.mxu0 %v1150_v37  ;;  %742 = vmatpush1.bf16.msra.mxu1 %v1152_v38 }
 0x23e   : > { %714 = vmatprep.subr.bf16.mxu0 %v644_v10  ;;  %757 = vmatprep.subr.bf16.mxu1 %v968_v9 }
 0x23f   : > { %v642_v11 = vpop.permute.xlu0 %641  ;;  %v636_v12 = vpop.permute.xlu1 %635 }
 0x240   : > { %v645_v3 = vsel %vm370_vm8, %v640_v63, %v642_v11  ;;  %v643_v2 = vsel %vm370_vm8, %v636_v12, %v638_v8 }
 0x241   : > { %715 = vmatpush2.bf16.msra.mxu0 %v643_v2  ;;  %758 = vmatpush2.bf16.msra.mxu1 %v645_v3 }
 0x244   : > { %717 = vmatmul.mubr.bf16.vlgmr.msra.gmra.mxu0 %v952_v55  ;;  %760 = vmatmul.mubr.bf16.vlgmr.msra.gmra.mxu1 %v952_v55 }
 0x24c   : > { %v670_v37 = vpop.permute.xlu0 %669  ;;  %v665_v38 = vpop.permute.xlu1 %664 }
 0x250   : > { %v930_v4 = vpop.permute.xlu0 %929  ;;  %v925_v0 = vpop.permute.xlu1 %924 }
 0x251   : > { %v932_v9 = vunpack.i.h.bf16 %v930_v4  ;;  %v931_v6 = vunpack.i.l.bf16 %v930_v4  ;;  %v927_v7 = vunpack.i.h.bf16 %v925_v0  ;;  %v926_v13 = vunpack.i.l.bf16 %v925_v0 }
 0x253   : > { %v793_v15 = vsel %vm370_vm8, %v926_v13, %v927_v7  ;;  %v795_v16 = vsel %vm370_vm8, %v931_v6, %v932_v9  ;;  %v794_v25 = vsel %vm370_vm8, %v927_v7, %v931_v6 }
 0x254   : > { %v940_v5 = vpop.permute.xlu0 %939  ;;  %v935_v14 = vpop.permute.xlu1 %934 }
 0x255   : > { %v942_v19 = vunpack.i.h.bf16 %v940_v5  ;;  %v941_v20 = vunpack.i.l.bf16 %v940_v5  ;;  %v937_v1 = vunpack.i.h.bf16 %v935_v14  ;;  %v936_v21 = vunpack.i.l.bf16 %v935_v14 }
 0x257   : > { %v796_v31 = vsel %vm370_vm8, %v936_v21, %v937_v1  ;;  %v798_v33 = vsel %vm370_vm8, %v941_v20, %v942_v19  ;;  %v797_v42 = vsel %vm370_vm8, %v937_v1, %v941_v20 }
 0x304   : > { %v718_v17 = vpop.f32.mrf.mxu0  ;;  %v761_v18 = vpop.f32.mrf.mxu1 }
 0x305   : > { %v719_v22 = vadd.f32 %v718_v17, %v665_v38  ;;  %v762_v23 = vadd.f32 %v761_v18, %v665_v38 }
 0x306   : > { %v720_v24 = vpop.f32.mrf.mxu0  ;;  %v763_v26 = vpop.f32.mrf.mxu1 }
 0x307   : > { %v805_v27 = vadd.f32 %v793_v15, %v719_v22  ;;  %v807_v28 = vadd.f32 %v795_v16, %v762_v23  ;;  %v721_v29 = vadd.f32 %v720_v24, %v665_v38 }
 0x308   : > { %v722_v30 = vpop.f32.mrf.mxu0  ;;  %v764_v32 = vpop.f32.mrf.mxu1 }
 0x309   : > { %v811_v34 = vmax.f32 %v805_v27, 0.0  ;;  %v813_v35 = vmax.f32 %v807_v28, 0.0  ;;  %v806_v36 = vadd.f32 %v794_v25, %v721_v29  ;;  %v723_v39 = vadd.f32 %v722_v30, %v670_v37 }
 0x30a   : > { %v765_v40 = vadd.f32 %v764_v32, %v670_v37  ;;  %v724_v41 = vpop.f32.mrf.mxu0  ;;  %v766_v43 = vpop.f32.mrf.mxu1 }
 0x30b   : > { %817 = vst [vmem:[%s224_s30] sm:$0xff] %v811_v34  ;;  %819 = vst [vmem:[%s224_s30 + $0x10] sm:$0xff] %v813_v35  ;;  %v812_v44 = vmax.f32 %v806_v36, 0.0  ;;  %v808_v45 = vadd.f32 %v796_v31, %v723_v39  ;;  %v725_v46 = vadd.f32 %v724_v41, %v670_v37 }
 0x30c   : > { %v810_v47 = vadd.f32 %v798_v33, %v765_v40 }
 0x30d   : > { %818 = vst [vmem:[%s224_s30 + $0x8] sm:$0xff] %v812_v44  ;;  %v814_v48 = vmax.f32 %v808_v45, 0.0  ;;  %v809_v49 = vadd.f32 %v797_v42, %v725_v46 }
 0x30e   : > { %v816_v50 = vmax.f32 %v810_v47, 0.0 }
 0x30f   : > { %820 = vst [vmem:[%s224_s30 + $0x18] sm:$0xff] %v814_v48  ;;  %v815_v51 = vmax.f32 %v809_v49, 0.0 }
 0x310   : > { %822 = vst [vmem:[%s224_s30 + $0x28] sm:$0xff] %v816_v50 }
 0x311   : > { %821 = vst [vmem:[%s224_s30 + $0x20] sm:$0xff] %v815_v51 }
 0x312 PF: > { %s15_s18 = sadd.s32 1, %s959_s18  }
 0x313   : > { %p12_p4 = scmp.ge.s32.totalorder %s15_s18, 4  }
 0x315   :  { %14 = sbr.rel (!%p12_p4) target bundleno = 1 (0x1), region = 71 }

</bundles_post_ra>
